<compile_context>
chip_gen: v6e
topology: v6e:2x2x1
jax: 0.10.0
libtpu: 0.0.40
codegen_flags: <defaults>
</compile_context>

<pallas_src>
import functools

import jax
import jax.numpy as jnp
from jax.experimental import pallas as pl
from jax.experimental.pallas import tpu as pltpu


def _round_up(x, m):
    return ((x + m - 1) // m) * m


def _round_down(x, m):
    return (x // m) * m


def _attention_kernel(keys_ref, qw_ref, mask_ref, ctx_ref, attn_ref):
    keys = keys_ref[...].astype(jnp.float32)      # (TB, S, K)
    qw = qw_ref[...].astype(jnp.float32)          # (TB, K)
    mask = mask_ref[...]                          # (TB, S) int32

    # scores[b, s] = sum_k keys[b, s, k] * qw[b, k]
    # Contracts the lane (last) dim of keys; keys stays in its stored layout,
    # no transpose of the big tile, no M=1 MXU matmul.
    scores = jnp.sum(keys * qw[:, None, :], axis=-1)          # (TB, S) f32

    # masked_fill(mask == 0, -inf) then softmax over S (f32 throughout).
    # (All-zero mask rows produce NaN, matching PyTorch masked_fill+softmax.)
    scores = jnp.where(mask == 0, jnp.float32(-jnp.inf), scores)
    m = jnp.max(scores, axis=-1, keepdims=True)
    e = jnp.exp(scores - m)
    denom = jnp.sum(e, axis=-1, keepdims=True)
    p = e * pl.reciprocal(denom, approx=True)                 # EUP rcp, no VALU divide

    # ctx[b, k] = sum_s p[b, s] * keys[b, s, k]   (contract sublane dim of keys)
    ctx = jnp.sum(p[:, :, None] * keys, axis=1)               # (TB, K)

    # Multi-sublane 2-D stores (TB rows at once).
    # TODO(synk): when K or S is not a multiple of 128 these stores are
    # lane-masked; folding batch rows into the lane dim (or padding K/S to 128)
    # would make them fully lane-dense.  Skipped here because the output bytes
    # are a small fraction of the keys stream and the fold needs an in-kernel
    # relayout.
    ctx_ref[...] = ctx.astype(ctx_ref.dtype)
    attn_ref[...] = p.astype(attn_ref.dtype)


@functools.partial(jax.jit, static_argnames=("stream_keys_bf16",))
def general_attention(keys, query, mask, weight, *, stream_keys_bf16=False):
    """keys: (B, S, K) f32, query: (L, B, D) f32, mask: (B, S) int {0,1},
       weight: (D, K) f32 (PyTorch nn.Linear(K, D, bias=False) weight layout).
       Returns (context (B, K), attn (B, S))."""
    B, S, K = keys.shape
    D = weight.shape[0]
    assert weight.shape == (D, K)

    # Hoisted projection: qw = query[-1] @ W  -> (B, K).  One dense XLA matmul.
    q_last = query[-1]                                                  # (B, D)
    qw = jnp.dot(q_last, weight, preferred_element_type=jnp.float32)    # (B, K)

    mask_i = mask.astype(jnp.int32)

    # Optionally stream keys as bf16 (halves the dominant HBM read); kernel
    # upcasts to f32 for the accumulations, so this is numerics-lossy only in
    # the keys themselves.  Default off to match the f32 PyTorch module.
    keys_in = keys.astype(jnp.bfloat16) if stream_keys_bf16 else keys
    key_itemsize = jnp.dtype(keys_in.dtype).itemsize

    # ---- generation-aware VMEM sizing -------------------------------------
    try:
        vmem_cap = int(pltpu.get_tpu_info().vmem_capacity_bytes)
    except Exception:                      # pragma: no cover - conservative fallback
        vmem_cap = 64 * 1024 * 1024        # v7x per-TensorCore VMEM (smallest gen)
    budget = int(vmem_cap * 0.6)           # headroom for compiler/internal scratch

    # Live bytes per batch row per pipeline stage:
    #   double-buffered keys block, double-buffered qw/mask/ctx/attn blocks,
    #   plus ~2 keys-sized f32 temporaries (keys*qw and p*keys products) in
    #   case the compiler materializes them instead of fusing the reductions.
    per_row = (
        2 * S * K * key_itemsize           # keys (x2 pipeline buffers)
        + 2 * S * K * 4                    # in-kernel f32 temporaries
        + 2 * (K * 4 + S * 4)              # qw + mask blocks (x2)
        + 2 * (K * 4 + S * 4)              # ctx + attn output blocks (x2)
    )
    max_tb = max(1, budget // per_row)

    # ---- batch tile (TB) selection -----------------------------------------
    if B <= 8:
        # One batch block; TB == padded batch extent keeps the (8,128) tiling
        # rule satisfied even when B < 8.
        TB = B
        # TODO(synk): for tiny B on v7x (2 TensorCores) a 1-step grid leaves one
        # core idle; an S grid axis ("arbitrary") with an online-softmax
        # accumulator would create work for both cores.
    else:
        # Largest multiple of 8 that fits the budget, capped at the padded batch.
        TB = _round_down(max(max_tb, 8), 8)
        TB = min(TB, _round_up(B, 8))
        # Keep at least 2 grid steps so the "parallel" batch axis can shard
        # across v7x's two TensorCores.
        TB = min(TB, max(8, _round_up(pl.cdiv(B, 2), 8)))
        # TODO(synk): if a single (1,S,K) row ever exceeds the budget (max_tb<8),
        # split S with an online-softmax accumulator instead of forcing TB=8.

    # Scoped-VMEM limit: cover the estimated live bytes (important on v5e's
    # 16 MiB default and for large TB on v6e), stay well under physical VMEM.
    est_bytes = per_row * TB + (2 << 20)
    vmem_limit_bytes = int(min(int(vmem_cap * 0.9), max(est_bytes, 32 << 20)))

    # Pad batch to a multiple of TB (padded rows: zero keys, mask=1 -> no NaNs).
    n_blocks = pl.cdiv(B, TB)
    Bp = n_blocks * TB
    if Bp != B:
        pad = Bp - B
        keys_p = jnp.pad(keys_in, ((0, pad), (0, 0), (0, 0)))
        qw_p = jnp.pad(qw, ((0, pad), (0, 0)))
        mask_p = jnp.pad(mask_i, ((0, pad), (0, 0)), constant_values=1)
    else:
        keys_p, qw_p, mask_p = keys_in, qw, mask_i

    ctx, attn = pl.pallas_call(
        _attention_kernel,
        out_shape=(
            jax.ShapeDtypeStruct((Bp, K), keys.dtype),
            jax.ShapeDtypeStruct((Bp, S), jnp.float32),
        ),
        grid_spec=pltpu.PrefetchScalarGridSpec(
            num_scalar_prefetch=0,
            grid=(n_blocks,),
            in_specs=[
                pl.BlockSpec((TB, S, K), lambda b: (b, 0, 0)),   # keys
                pl.BlockSpec((TB, K), lambda b: (b, 0)),         # qw = q @ W
                pl.BlockSpec((TB, S), lambda b: (b, 0)),         # mask
            ],
            out_specs=[
                pl.BlockSpec((TB, K), lambda b: (b, 0)),         # context
                pl.BlockSpec((TB, S), lambda b: (b, 0)),         # attention scores
            ],
        ),
        compiler_params=pltpu.CompilerParams(
            dimension_semantics=("parallel",),
            vmem_limit_bytes=vmem_limit_bytes,
        ),
    )(keys_p, qw_p, mask_p)

    return ctx[:B], attn[:B]


def _reference(keys, query, mask, weight):
    q = query[-1]                                            # (B, D)
    mapped = jnp.einsum('bsk,dk->bsd', keys, weight)         # (B, S, D)
    scores = jnp.einsum('bd,bsd->bs', q, mapped)             # (B, S)
    scores = jnp.where(mask == 0, -jnp.inf, scores)
    p = jax.nn.softmax(scores, axis=1)
    ctx = jnp.einsum('bs,bsk->bk', p, keys)
    return ctx, p


if __name__ == "__main__":
    # Small shapes consistent with the module: bidirectional encoder hidden
    # dim E=16 -> keys feature K = 2*E = 32; decoder hidden D = 32.
    B, S, E, D, L = 2, 8, 16, 32, 2
    K = 2 * E

    key = jax.random.PRNGKey(0)
    k_keys, k_query, k_w = jax.random.split(key, 3)

    keys = jax.random.normal(k_keys, (B, S, K), dtype=jnp.float32)
    query = jax.random.normal(k_query, (L, B, D), dtype=jnp.float32)
    # nn.Linear(2E, D, bias=False) weight: shape (D, 2E).
    weight = (jax.random.normal(k_w, (D, K), dtype=jnp.float32) * 0.1)
    # Length-style mask: first row fully valid, second row has trailing padding.
    mask = jnp.array([[1] * S, [1] * (S - 3) + [0] * 3], dtype=jnp.int32)

    ctx, attn = general_attention(keys, query, mask, weight)
    jax.block_until_ready((ctx, attn))

    ctx_ref, attn_ref = _reference(keys, query, mask, weight)
    # Tolerances relaxed slightly vs exact-divide version because the softmax
    # denominator uses the EUP approximate reciprocal.
    assert jnp.allclose(ctx, ctx_ref, atol=5e-3, rtol=5e-3), "context mismatch"
    assert jnp.allclose(attn, attn_ref, atol=5e-3, rtol=5e-3), "attn mismatch"

    print("KERNEL_OK")
</pallas_src>

<mosaic_0001>
module attributes {stable_mosaic.version = 11 : i64} {
  func.func @_attention_kernel(%arg0: i32, %arg1: memref<2x8x32xf32, #tpu.memory_space<vmem>>, %arg2: memref<2x32xf32, #tpu.memory_space<vmem>>, %arg3: memref<2x8xi32, #tpu.memory_space<vmem>>, %arg4: memref<2x32xf32, #tpu.memory_space<vmem>>, %arg5: memref<2x8xf32, #tpu.memory_space<vmem>>) attributes {dimension_semantics = [#tpu.dimension_semantics<parallel>], iteration_bounds = array<i64: 1>, scalar_prefetch = 0 : i64, scratch_operands = 0 : i64, tpu.core_type = #tpu.core_type<tc>, window_params = [{transform_indices = @transform_0, window_bounds = array<i64: 2, 8, 32>}, {transform_indices = @transform_1, window_bounds = array<i64: 2, 32>}, {transform_indices = @transform_2, window_bounds = array<i64: 2, 8>}, {transform_indices = @transform_3, window_bounds = array<i64: 2, 32>}, {transform_indices = @transform_4, window_bounds = array<i64: 2, 8>}]} {
    %c0 = arith.constant 0 : index
    %c0_0 = arith.constant 0 : index
    %c0_1 = arith.constant 0 : index
    %0 = vector.load %arg1[%c0, %c0_0, %c0_1] : memref<2x8x32xf32, #tpu.memory_space<vmem>>, vector<2x8x32xf32>
    %c0_2 = arith.constant 0 : index
    %c0_3 = arith.constant 0 : index
    %1 = vector.load %arg2[%c0_2, %c0_3] : memref<2x32xf32, #tpu.memory_space<vmem>>, vector<2x32xf32>
    %c0_4 = arith.constant 0 : index
    %c0_5 = arith.constant 0 : index
    %2 = vector.load %arg3[%c0_4, %c0_5] : memref<2x8xi32, #tpu.memory_space<vmem>>, vector<2x8xi32>
    %3 = vector.shape_cast %1 : vector<2x32xf32> to vector<2x1x32xf32>
    %4 = vector.broadcast %3 : vector<2x1x32xf32> to vector<2x8x32xf32>
    %5 = arith.mulf %0, %4 : vector<2x8x32xf32>
    %cst = arith.constant dense<0.000000e+00> : vector<2x8xf32>
    %6 = vector.multi_reduction <add>, %5, %cst [2] : vector<2x8x32xf32> to vector<2x8xf32>
    %c0_i32 = arith.constant 0 : i32
    %7 = vector.broadcast %c0_i32 : i32 to vector<2x8xi32>
    %8 = arith.cmpi eq, %2, %7 : vector<2x8xi32>
    %cst_6 = arith.constant 0xFF800000 : f32
    %9 = vector.broadcast %cst_6 : f32 to vector<2x8xf32>
    %10 = arith.select %8, %9, %6 : vector<2x8xi1>, vector<2x8xf32>
    %cst_7 = arith.constant dense<0xFF800000> : vector<2xf32>
    %11 = vector.multi_reduction <maximumf>, %10, %cst_7 [1] : vector<2x8xf32> to vector<2xf32>
    %12 = vector.shape_cast %11 : vector<2xf32> to vector<2x1xf32>
    %13 = vector.broadcast %12 : vector<2x1xf32> to vector<2x8xf32>
    %14 = arith.subf %10, %13 : vector<2x8xf32>
    %15 = math.exp %14 : vector<2x8xf32>
    %cst_8 = arith.constant dense<0.000000e+00> : vector<2xf32>
    %16 = vector.multi_reduction <add>, %15, %cst_8 [1] : vector<2x8xf32> to vector<2xf32>
    %17 = vector.shape_cast %16 : vector<2xf32> to vector<2x1xf32>
    %18 = tpu.reciprocal %17 {approx = true} : vector<2x1xf32> -> vector<2x1xf32>
    %19 = vector.broadcast %18 : vector<2x1xf32> to vector<2x8xf32>
    %20 = arith.mulf %15, %19 : vector<2x8xf32>
    %21 = vector.shape_cast %20 : vector<2x8xf32> to vector<2x8x1xf32>
    %22 = vector.broadcast %21 : vector<2x8x1xf32> to vector<2x8x32xf32>
    %23 = arith.mulf %22, %0 : vector<2x8x32xf32>
    %cst_9 = arith.constant dense<0.000000e+00> : vector<2x32xf32>
    %24 = vector.multi_reduction <add>, %23, %cst_9 [1] : vector<2x8x32xf32> to vector<2x32xf32>
    %c0_10 = arith.constant 0 : index
    %c0_11 = arith.constant 0 : index
    %25 = vector.load %arg4[%c0_10, %c0_11] : memref<2x32xf32, #tpu.memory_space<vmem>>, vector<2x32xf32>
    tpu.vector_store %arg4[%c0_10, %c0_11], %24 {strides = array<i32>} : memref<2x32xf32, #tpu.memory_space<vmem>>, vector<2x32xf32>,
    %c0_12 = arith.constant 0 : index
    %c0_13 = arith.constant 0 : index
    %26 = vector.load %arg5[%c0_12, %c0_13] : memref<2x8xf32, #tpu.memory_space<vmem>>, vector<2x8xf32>
    tpu.vector_store %arg5[%c0_12, %c0_13], %20 {strides = array<i32>} : memref<2x8xf32, #tpu.memory_space<vmem>>, vector<2x8xf32>,
    return
  }
  func.func @transform_0(%arg0: i32) -> (i32, i32, i32) {
    %c0_i32 = arith.constant 0 : i32
    %c0_i32_0 = arith.constant 0 : i32
    %c0_i32_1 = arith.constant 0 : i32
    return %arg0, %c0_i32, %c0_i32_0 : i32, i32, i32
  }
  func.func @transform_1(%arg0: i32) -> (i32, i32) {
    %c0_i32 = arith.constant 0 : i32
    %c0_i32_0 = arith.constant 0 : i32
    return %arg0, %c0_i32 : i32, i32
  }
  func.func @transform_2(%arg0: i32) -> (i32, i32) {
    %c0_i32 = arith.constant 0 : i32
    %c0_i32_0 = arith.constant 0 : i32
    return %arg0, %c0_i32 : i32, i32
  }
  func.func @transform_3(%arg0: i32) -> (i32, i32) {
    %c0_i32 = arith.constant 0 : i32
    %c0_i32_0 = arith.constant 0 : i32
    return %arg0, %c0_i32 : i32, i32
  }
  func.func @transform_4(%arg0: i32) -> (i32, i32) {
    %c0_i32 = arith.constant 0 : i32
    %c0_i32_0 = arith.constant 0 : i32
    return %arg0, %c0_i32 : i32, i32
  }
}

</mosaic_0001>

<bundles_post_ra>
// kernel: general_attention.1
= control target key start
LH: loop header
LB: loop body
LE: loop exit
PB: predicated region body
PF: predicated region fallthrough
CT: control target
= control target key end

     0   :  { %10 = vsyncpa [#allocation3], 0  ;;  %v34_v0 = vlaneseq  ;;  %s265_s0 = inlined_call_operand.vmem [shape: f32[2,8,32], index: 0, kind: input, shape index: {}]   ;;  %s266_s1 = inlined_call_operand.vmem [shape: f32[2,32], index: 1, kind: input, shape index: {}]   ;;  %s267_s2 = inlined_call_operand.vmem [shape: s32[2,8], index: 2, kind: input, shape index: {}]   ;;  %s268_s3 = inlined_call_operand.hbm [shape: f32[2,32], index: 3, kind: output, shape index: {0}]   ;;  %s269_s4 = inlined_call_operand.hbm [shape: f32[2,8], index: 4, kind: output, shape index: {1}]  }
   0x1   :  { %11 = vsyncpa [#allocation5], 0  ;;  %v210_v1 = vmov 1966171168   ;;  %v18_v11 = vld [vmem:[%s265_s0] sm:$0xff]  ;;  %v19_v12 = vld [vmem:[%s265_s0 + $0x8] sm:$0xff] }
   0x2   :  { %v32_v2 = vunpack.c.l.s4 %v210_v1  ;;  %v35_v3 = vshrl.u32 %v34_v0, 7  ;;  %v158_v4 = vld.sshfl [vmem:[%s266_s1] sm:$0x11 pattern:$0x75316420]  ;;  %vm57_vm0 = vcmask 261120  }
   0x3   :  { %v30_v5 = vcombine.high %v158_v4, %v158_v4  ;;  %v68_v19 = vand.u32 127, %v34_v0  ;;  %v21_v22 = vld [vmem:[%s267_s2] sm:$0x3]  ;;  %vm77_vm1 = vcmask 1041409   ;;  %vm81_vm3 = vcmask 58368   ;;  %s211_s0 = smov [#allocation4]  }
   0x4   :  { %v33_v6 = vunpack.c.0.s8 %v32_v2  ;;  %v47_v8 = vsub.s32 0, %v35_v3  ;;  %vm64_vm2 = vcmp.eq.s32.totalorder %v21_v22, 0  ;;  %v102_v35 = vsub.s32 1, %v35_v3  ;;  %s146_s2 = sshll.u32 %s211_s0, 4  ;;  %s147_s2 = int_to_ptr.vmem [resolvable:$true] %s146_s2 }
   0x5   :  { %v71_v21 = vsub.s32 %v68_v19, %v35_v3  ;;  %s166_s22 = scalar_lea.vmem %s147_s2, 32  ;;  %p171_p1 = scmp.lt.s32.totalorder %s147_s2, %s147_s2 }
   0x6   :  { %v36_v7 = vsub.s32 %v33_v6, %v35_v3  ;;  %p167_p0 = scmp.ne.s32.totalorder %s147_s2, %s166_s22  ;;  %p172_p2 = scmp.lt.s32.totalorder %s166_s22, %s166_s22 }
   0x8   :  { %v37_v9 = vrot.slane %v158_v4, %v36_v7  ;;  %v44_v10 = vrot.slane %v30_v5, %v36_v7  ;;  %p173_p3 = por %p172_p2, %p171_p1 }
   0xa   :  { %v48_v13 = vrot.slane %v37_v9, %v47_v8  ;;  %v52_v14 = vrot.slane %v44_v10, %v47_v8  ;;  %p174_p4 = pnand %p173_p3, %p167_p0 }
   0xc   :  { %v55_v15 = vmul.f32 %v48_v13, %v18_v11  ;;  %v56_v16 = vmul.f32 %v52_v14, %v19_v12 }
   0xe   :  { %v58_v17 = vsel %vm57_vm0, %v55_v15, 0.0  ;;  %v61_v18 = vsel %vm57_vm0, %v56_v16, 0.0 }
   0xf   :  { %59 = vadd.xlane.f32.xlu0 %v58_v17 }
  0x13   :  { %62 = vadd.xlane.f32.xlu0 %v61_v18 }
  0x98   :  { %v60_v20 = vpop.xlane.xlu0 %59 }
  0x99   :  { %v72_v24 = vrot.slane %v60_v20, %v71_v21 }
  0x9c   :  { %v63_v23 = vpop.xlane.xlu0 %62 }
  0x9d   :  { %v76_v25 = vrot.slane %v63_v23, %v71_v21 }
  0x9f   :  { %v78_v26 = vsel %vm77_vm1, %v76_v25, %v72_v24 }
  0xa0   :  { %v80_v27 = vsel %vm64_vm2, -inf, %v78_v26 }
  0xa1   :  { %v82_v28 = vsel %vm81_vm3, %v80_v27, -inf }
  0xa2   :  { %83 = vmax.xlane.f32.xlu1 %v82_v28 }
 0x12b   :  { %v84_v29 = vpop.xlane.xlu1 %83 }
 0x12c   :  { %v85_v30 = vsub.f32 %v80_v27, %v84_v29 }
 0x12e   :  { %v86_v31 = vmul.f32 1.442695, %v85_v30 }
 0x130   :  { %162 = vpow2.f32 %v86_v31 }
 0x13d   :  { %v163_v32 = vpop.eup %162 }
 0x13e   :  { %v88_v33 = vsel %vm81_vm3, %v163_v32, 0.0 }
 0x13f   :  { %89 = vadd.xlane.f32.xlu1 %v88_v33 }
 0x1c8   :  { %v90_v34 = vpop.xlane.xlu1 %89 }
 0x1c9   :  { %164 = vrcp.f32 %v90_v34 }
 0x1d6   :  { %v165_v36 = vpop.eup %164 }
 0x1d7   :  { %v92_v37 = vmul.f32 %v165_v36, %v163_v32 }
 0x1d9   :  { %v103_v38 = vrot.slane %v92_v37, %v102_v35  ;;  %129 = vst.msk [vmem:[#allocation4] sm:$0x3] %vm81_vm3, %v92_v37  ;;  %v96_v39 = vrot.slane %v92_v37, %v47_v8 }
 0x1db   :  { %105 = vbcast.lane.b32.xlu1 %v103_v38, 256  ;;  %98 = vbcast.lane.b32.xlu0 %v96_v39, 256 }
 0x1dc   :  { %177 = shalt.err (!%p174_p4)
}
 0x1dd   :  { %149 = dma.vmem_to_hbm [thread:$0]  %s147_s2, 32, %s269_s4, [#allocation5]   ;;  %vm127_vm4 = vcmask 254976  }
 0x1de   :  { %s212_s25 = smov [#allocation2]  }
 0x1df   :  { %s136_s4 = sshll.u32 %s212_s25, 4  ;;  %s137_s4 = int_to_ptr.vmem [resolvable:$true] %s136_s4 }
 0x1e0   :  { %s186_s26 = scalar_lea.vmem %s137_s4, 32  ;;  %p191_p6 = scmp.lt.s32.totalorder %s137_s4, %s137_s4 }
 0x1e1   :  { %p187_p5 = scmp.ne.s32.totalorder %s137_s4, %s186_s26  ;;  %p192_p7 = scmp.lt.s32.totalorder %s186_s26, %s186_s26 }
 0x1e3   :  { %p193_p8 = por %p192_p7, %p191_p6 }
 0x1e5   :  { %p194_p9 = pnand %p193_p8, %p187_p5 }
 0x24d   :  { %v106_v40 = vpop.permute.xlu1 %105  ;;  %v99_v41 = vpop.permute.xlu0 %98 }
 0x24e   :  { %v108_v42 = vmul.f32 %v106_v40, %v19_v12  ;;  %v107_v43 = vmul.f32 %v99_v41, %v18_v11 }
 0x250   :  { %v116_v44 = vsel %vm57_vm0, %v108_v42, 0.0  ;;  %v109_v45 = vsel %vm57_vm0, %v107_v43, 0.0 }
 0x251   :  { %v117_v46 = vrot.slane %v116_v44, 4  ;;  %v110_v47 = vrot.slane %v109_v45, 4 }
 0x253   :  { %v118_v48 = vadd.f32 %v117_v46, %v116_v44  ;;  %v111_v49 = vadd.f32 %v110_v47, %v109_v45 }
 0x255   :  { %v119_v50 = vrot.slane %v118_v48, 2  ;;  %v112_v51 = vrot.slane %v111_v49, 2 }
 0x257   :  { %v120_v52 = vadd.f32 %v119_v50, %v118_v48  ;;  %v113_v53 = vadd.f32 %v112_v51, %v111_v49 }
 0x259   :  { %v121_v54 = vrot.slane %v120_v52, 1  ;;  %v114_v55 = vrot.slane %v113_v53, 1 }
 0x25b   :  { %v115_v56 = vadd.f32 %v114_v55, %v113_v53  ;;  %v122_v57 = vadd.f32 %v121_v54, %v120_v52 }
 0x25d   :  { %v125_v58 = vsel %vm77_vm1, %v122_v57, %v115_v56 }
 0x25e   :  { %128 = vst.msk [vmem:[#allocation2] sm:$0x3] %vm127_vm4, %v125_v58 }
 0x25f   :  { %197 = shalt.err (!%p194_p9)
}
 0x260   :  { %139 = dma.vmem_to_hbm [thread:$0]  %s137_s4, 32, %s268_s3, [#allocation3]  }
 0x261   :  { %206 = dma.done.wait [#allocation3], 32  }
 0x262   :  { %207 = vsyncadd [#allocation3], 4294967264 }
 0x263   :  { %208 = dma.done.wait [#allocation5], 32  }
 0x264   :  { %209 = vsyncadd [#allocation5], 4294967264 }
 0x265   :  { %156 = vsyncpa [#allocation3], 1 }
 0x266   :  { %157 = vsyncpa [#allocation5], 1 }

</bundles_post_ra>
